<compile_context>
chip_gen: v7x
topology: tpu7x:2x2x1
jax: 0.10.0
libtpu: 0.0.40
codegen_flags: <defaults>
</compile_context>

<pallas_src>
import functools

import jax
import jax.numpy as jnp
from jax.experimental import pallas as pl
from jax.experimental.pallas import tpu as pltpu

LANES = 128
SUBLANES = 8
TARGET_STEP_BYTES = 4 << 20  # combined x+y bytes per grid step (~2 MiB / input)


def _round_up(v, m):
    return (v + m - 1) // m * m


def _num_tensorcores():
    """Best-effort TensorCores-per-device (2 on megacore chips such as v7x)."""
    try:
        info = pltpu.get_tpu_info()
        for attr in ("num_tensorcores", "tensorcore_count", "num_cores",
                     "core_count", "num_cores_per_chip"):
            v = getattr(info, attr, None)
            if isinstance(v, int) and v >= 1:
                return v
    except Exception:
        pass
    try:
        dev = jax.devices()[0]
        v = getattr(dev, "num_cores", None)
        if isinstance(v, int) and v >= 1:
            return v
        kind = str(getattr(dev, "device_kind", "")).lower()
        if "v4" in kind or "v7" in kind:
            return 2
    except Exception:
        pass
    return 1  # conservative: no megacore split unless we can confirm it


def _charbonnier_sum_kernel(x_ref, y_ref, out_ref, acc_ref, *,
                            eps2, block_rows, blocks_per_split,
                            rows_valid, needs_mask):
    c = pl.program_id(0)   # split axis ("parallel"; sharded across TCs on v7x)
    j = pl.program_id(1)   # streaming / reduction axis ("arbitrary")

    @pl.when(j == 0)
    def _init():
        acc_ref[...] = jnp.zeros_like(acc_ref)

    diff = x_ref[...].astype(jnp.float32) - y_ref[...].astype(jnp.float32)
    val = jnp.sqrt(diff * diff + eps2)

    def _accumulate(v):
        # Fold the tile to (8, 128) with pure VALU vreg adds (layout-preserving
        # reshape); the single sublane+lane reduce happens once in the wrapper.
        acc_ref[...] += jnp.sum(
            v.reshape(block_rows // SUBLANES, SUBLANES, LANES), axis=0)

    if needs_mask:
        block_idx = c * blocks_per_split + j
        # Only the ragged last block and phantom (clamped) blocks need masking.
        is_edge = (block_idx + 1) * block_rows > rows_valid

        @pl.when(is_edge)
        def _masked():
            row_ids = (block_idx * block_rows
                       + jax.lax.broadcasted_iota(jnp.int32, val.shape, 0))
            _accumulate(jnp.where(row_ids < rows_valid, val, 0.0))

        @pl.when(jnp.logical_not(is_edge))
        def _plain():
            _accumulate(val)
    else:
        _accumulate(val)

    @pl.when(j == blocks_per_split - 1)
    def _finalize():
        # Lane-dense, (8,128)-aligned per-split partial; no in-kernel
        # cross-lane reduction and no sub-128-lane masked store.
        out_ref[0] = acc_ref[...]


def charbonnier_loss(x, y, epsilon=0.001):
    assert x.shape == y.shape, "x and y must have the same shape"
    eps2 = float(epsilon) * float(epsilon)
    n = int(x.size)
    assert n > 0

    # Keep native dtype through the DMA (bf16 inputs halve HBM traffic);
    # the kernel upcasts to f32 for the math.
    xf = jnp.ravel(x)
    yf = jnp.ravel(y)

    # The kernel streams a (rows, 128) slab with rows a multiple of 8; the
    # sub-(8*128) remainder (< 1024 elements) is summed in plain JAX -- no
    # full-tensor padding copy.
    chunk = LANES * SUBLANES
    n_main = (n // chunk) * chunk
    tail_sum = None
    if n_main < n:
        xt = xf[n_main:].astype(jnp.float32)
        yt = yf[n_main:].astype(jnp.float32)
        dt = xt - yt
        tail_sum = jnp.sum(jnp.sqrt(dt * dt + eps2))

    if n_main == 0:
        total = tail_sum
    else:
        rows = n_main // LANES            # multiple of 8 by construction
        x2d = xf[:n_main].reshape(rows, LANES)
        y2d = yf[:n_main].reshape(rows, LANES)

        # Dtype-aware streaming tile: ~4 MiB of combined x+y per grid step.
        bytes_per_row = LANES * (x2d.dtype.itemsize + y2d.dtype.itemsize)
        default_rows = max(
            SUBLANES,
            (TARGET_STEP_BYTES // bytes_per_row) // SUBLANES * SUBLANES)
        block_rows = min(default_rows, rows)
        total_blocks = pl.cdiv(rows, block_rows)
        last_block = total_blocks - 1

        # 2-way split only on true multi-TC devices and only when (nearly)
        # balanced; otherwise it is just a longer sequential loop plus a
        # fully-masked phantom block's wasted DMA.
        num_splits = 1
        if _num_tensorcores() >= 2 and total_blocks >= 2:
            if total_blocks % 2 == 0 or total_blocks >= 8:
                num_splits = 2
        blocks_per_split = pl.cdiv(total_blocks, num_splits)

        has_phantom = num_splits * blocks_per_split > total_blocks
        needs_mask = has_phantom or (rows % block_rows != 0)
        # Guard: any clamped phantom block MUST be neutralized by the mask.
        assert (not has_phantom) or needs_mask

        kernel = functools.partial(
            _charbonnier_sum_kernel,
            eps2=eps2,
            block_rows=block_rows,
            blocks_per_split=blocks_per_split,
            rows_valid=rows,
            needs_mask=needs_mask,
        )

        if has_phantom:
            def in_map(c, j):
                # Clamp phantom blocks in-bounds; the kernel zeroes them out.
                return (jnp.minimum(c * blocks_per_split + j, last_block), 0)
        else:
            def in_map(c, j):
                return (c * blocks_per_split + j, 0)

        # 2 inputs x 2 pipeline buffers x per-input tile, plus slack.
        tile_bytes = block_rows * bytes_per_row
        vmem_limit = int(_round_up(2 * tile_bytes + (6 << 20), 1 << 20))
        vmem_limit = max(16 << 20, min(vmem_limit, 64 << 20))

        partials = pl.pallas_call(
            kernel,
            out_shape=jax.ShapeDtypeStruct((num_splits, SUBLANES, LANES),
                                           jnp.float32),
            grid_spec=pltpu.PrefetchScalarGridSpec(
                num_scalar_prefetch=0,
                grid=(num_splits, blocks_per_split),
                in_specs=[
                    pl.BlockSpec((block_rows, LANES), in_map),
                    pl.BlockSpec((block_rows, LANES), in_map),
                ],
                out_specs=pl.BlockSpec((1, SUBLANES, LANES),
                                       lambda c, j: (c, 0, 0)),
                scratch_shapes=[pltpu.VMEM((SUBLANES, LANES), jnp.float32)],
            ),
            compiler_params=pltpu.CompilerParams(
                dimension_semantics=("parallel", "arbitrary"),
                vmem_limit_bytes=vmem_limit,
            ),
        )(x2d, y2d)

        total = jnp.sum(partials)
        if tail_sum is not None:
            total = total + tail_sum

    # NOTE: sequential f32 block accumulation can drift slightly from a
    # pairwise-summed reference for extremely large n (>1e8 elements).
    return total / jnp.float32(n)


if __name__ == "__main__":
    key = jax.random.PRNGKey(0)
    kx, ky = jax.random.split(key)
    # NCHW, matching the PyTorch module's usual input convention.
    x = jax.random.normal(kx, (2, 4, 16, 16), dtype=jnp.float32)
    y = jax.random.normal(ky, (2, 4, 16, 16), dtype=jnp.float32)

    loss = charbonnier_loss(x, y, epsilon=0.001)
    jax.block_until_ready(loss)

    # Pure-JAX reference check (matches torch.mean(sqrt((x-y)^2 + eps^2))).
    ref = jnp.mean(jnp.sqrt((x - y) ** 2 + 0.001 ** 2))
    assert jnp.allclose(loss, ref, rtol=1e-5, atol=1e-6), (loss, ref)

    print("KERNEL_OK")
</pallas_src>

<mosaic_0001>
module attributes {stable_mosaic.version = 11 : i64} {
  func.func @_charbonnier_sum_kernel(%arg0: i32, %arg1: i32, %arg2: memref<16x128xf32, #tpu.memory_space<vmem>>, %arg3: memref<16x128xf32, #tpu.memory_space<vmem>>, %arg4: memref<1x8x128xf32, #tpu.memory_space<vmem>>, %arg5: memref<8x128xf32, #tpu.memory_space<vmem>>) attributes {dimension_semantics = [#tpu.dimension_semantics<parallel>, #tpu.dimension_semantics<arbitrary>], iteration_bounds = array<i64: 1, 1>, scalar_prefetch = 0 : i64, scratch_operands = 1 : i64, tpu.core_type = #tpu.core_type<tc>, window_params = [{transform_indices = @transform_0, window_bounds = array<i64: 16, 128>}, {transform_indices = @transform_1, window_bounds = array<i64: 16, 128>}, {transform_indices = @transform_2, window_bounds = array<i64: 1, 8, 128>}]} {
    %c0_i32 = arith.constant 0 : i32
    %0 = arith.cmpi eq, %arg1, %c0_i32 : i32
    %1 = arith.extui %0 : i1 to i32
    %c0_i32_0 = arith.constant 0 : i32
    %2 = arith.cmpi ne, %1, %c0_i32_0 : i32
    scf.if %2 {
      %cst_11 = arith.constant 0.000000e+00 : f32
      %18 = vector.broadcast %cst_11 : f32 to vector<8x128xf32>
      %c0_12 = arith.constant 0 : index
      %c0_13 = arith.constant 0 : index
      %19 = vector.load %arg5[%c0_12, %c0_13] : memref<8x128xf32, #tpu.memory_space<vmem>>, vector<8x128xf32>
      tpu.vector_store %arg5[%c0_12, %c0_13], %18 {strides = array<i32>} : memref<8x128xf32, #tpu.memory_space<vmem>>, vector<8x128xf32>,
    } else {
    }
    %c0 = arith.constant 0 : index
    %c0_1 = arith.constant 0 : index
    %3 = vector.load %arg2[%c0, %c0_1] : memref<16x128xf32, #tpu.memory_space<vmem>>, vector<16x128xf32>
    %c0_2 = arith.constant 0 : index
    %c0_3 = arith.constant 0 : index
    %4 = vector.load %arg3[%c0_2, %c0_3] : memref<16x128xf32, #tpu.memory_space<vmem>>, vector<16x128xf32>
    %5 = arith.subf %3, %4 : vector<16x128xf32>
    %6 = arith.mulf %5, %5 : vector<16x128xf32>
    %cst = arith.constant 9.99999997E-7 : f32
    %7 = vector.broadcast %cst : f32 to vector<16x128xf32>
    %8 = arith.addf %6, %7 : vector<16x128xf32>
    %9 = math.sqrt %8 : vector<16x128xf32>
    %c0_4 = arith.constant 0 : index
    %c0_5 = arith.constant 0 : index
    %10 = vector.load %arg5[%c0_4, %c0_5] : memref<8x128xf32, #tpu.memory_space<vmem>>, vector<8x128xf32>
    %11 = vector.shape_cast %9 : vector<16x128xf32> to vector<2x8x128xf32>
    %cst_6 = arith.constant dense<0.000000e+00> : vector<8x128xf32>
    %12 = vector.multi_reduction <add>, %11, %cst_6 [0] : vector<2x8x128xf32> to vector<8x128xf32>
    %13 = arith.addf %10, %12 : vector<8x128xf32>
    %c0_7 = arith.constant 0 : index
    %c0_8 = arith.constant 0 : index
    %14 = vector.load %arg5[%c0_7, %c0_8] : memref<8x128xf32, #tpu.memory_space<vmem>>, vector<8x128xf32>
    tpu.vector_store %arg5[%c0_7, %c0_8], %13 {strides = array<i32>} : memref<8x128xf32, #tpu.memory_space<vmem>>, vector<8x128xf32>,
    %c0_i32_9 = arith.constant 0 : i32
    %15 = arith.cmpi eq, %arg1, %c0_i32_9 : i32
    %16 = arith.extui %15 : i1 to i32
    %c0_i32_10 = arith.constant 0 : i32
    %17 = arith.cmpi ne, %16, %c0_i32_10 : i32
    scf.if %17 {
      %c0_11 = arith.constant 0 : index
      %c0_12 = arith.constant 0 : index
      %18 = vector.load %arg5[%c0_11, %c0_12] : memref<8x128xf32, #tpu.memory_space<vmem>>, vector<8x128xf32>
      %c0_13 = arith.constant 0 : index
      %c0_14 = arith.constant 0 : index
      %c0_15 = arith.constant 0 : index
      %19 = vector.load %arg4[%c0_13, %c0_14, %c0_15] : memref<1x8x128xf32, #tpu.memory_space<vmem>>, vector<1x8x128xf32>
      %20 = vector.shape_cast %19 : vector<1x8x128xf32> to vector<8x128xf32>
      %21 = vector.shape_cast %18 : vector<8x128xf32> to vector<1x8x128xf32>
      tpu.vector_store %arg4[%c0_13, %c0_14, %c0_15], %21 {strides = array<i32>} : memref<1x8x128xf32, #tpu.memory_space<vmem>>, vector<1x8x128xf32>,
    } else {
    }
    return
  }
  func.func @transform_0(%arg0: i32, %arg1: i32) -> (i32, i32) {
    %c1_i32 = arith.constant 1 : i32
    %0 = arith.muli %arg0, %c1_i32 : i32
    %1 = arith.addi %0, %arg1 : i32
    %c0_i32 = arith.constant 0 : i32
    %c0_i32_0 = arith.constant 0 : i32
    return %1, %c0_i32 : i32, i32
  }
  func.func @transform_1(%arg0: i32, %arg1: i32) -> (i32, i32) {
    %c1_i32 = arith.constant 1 : i32
    %0 = arith.muli %arg0, %c1_i32 : i32
    %1 = arith.addi %0, %arg1 : i32
    %c0_i32 = arith.constant 0 : i32
    %c0_i32_0 = arith.constant 0 : i32
    return %1, %c0_i32 : i32, i32
  }
  func.func @transform_2(%arg0: i32, %arg1: i32) -> (i32, i32, i32) {
    %c0_i32 = arith.constant 0 : i32
    %c0_i32_0 = arith.constant 0 : i32
    %c0_i32_1 = arith.constant 0 : i32
    return %arg0, %c0_i32, %c0_i32_0 : i32, i32, i32
  }
}

</mosaic_0001>

<bundles_post_ra>
// kernel: tpu_custom_call.1
= control target key start
LH: loop header
LB: loop body
LE: loop exit
PB: predicated region body
PF: predicated region fallthrough
CT: control target
= control target key end

     0   :  { %7 = vsyncpa [#allocation4], 0  ;;  %s243_s0 = inlined_call_operand.hbm [shape: f32[16,128], index: 0, kind: input, shape index: {}]   ;;  %s244_s1 = inlined_call_operand.hbm [shape: f32[16,128], index: 1, kind: input, shape index: {}]   ;;  %s245_s2 = inlined_call_operand.hbm [shape: f32[1,8,128], index: 2, kind: output, shape index: {}]  }
   0x1   :  { %8 = vsyncpa [#allocation7], 0 }
   0x2   :  { %9 = vsyncpa [#allocation5], 0  ;;  %s187_s9 = smov [#allocation3]   ;;  %s115_s13 = scalar_lea.hbm %s243_s0, 256 }
   0x3   :  { %s19_s10 = sshll.u32 %s187_s9, 4  ;;  %p116_p0 = scmp.ne.s32.totalorder %s243_s0, %s115_s13  ;;  %s20_s10 = int_to_ptr.vmem [resolvable:$true] %s19_s10 }
   0x4   :  { %p119_p1 = scmp.lt.u32.totalorder %s115_s13, %s243_s0 }
   0x6   :  { %p121_p2 = pnand %p119_p1, %p116_p0 }
   0x8   :  { %124 = shalt.err (!%p121_p2)
}
   0x9   :  { %s125_s18 = scalar_lea.vmem %s20_s10, 256  ;;  %p130_p4 = scmp.lt.s32.totalorder %s20_s10, %s20_s10 }
   0xa   :  { %p126_p3 = scmp.ne.s32.totalorder %s20_s10, %s125_s18  ;;  %p131_p5 = scmp.lt.s32.totalorder %s125_s18, %s125_s18 }
   0xc   :  { %p132_p6 = por %p131_p5, %p130_p4 }
   0xe   :  { %p133_p7 = pnand %p132_p6, %p126_p3 }
  0x10   :  { %136 = shalt.err (!%p133_p7)
}
  0x11   :  { %s188_s19 = smov 128   ;;  %s189_s20 = smov 8  }
  0x12   :  { %25 = dma.hbm_to_vmem [thread:$0]  %s243_s0, 256, %s20_s10, [#allocation4], %s188_s19, %s188_s19, %s189_s20  }
  0x13   :  { %s190_s23 = smov [#allocation6]   ;;  %s137_s27 = scalar_lea.hbm %s244_s1, 256 }
  0x14   :  { %s35_s24 = sshll.u32 %s190_s23, 4  ;;  %p138_p8 = scmp.ne.s32.totalorder %s244_s1, %s137_s27  ;;  %s36_s24 = int_to_ptr.vmem [resolvable:$true] %s35_s24 }
  0x15   :  { %p141_p9 = scmp.lt.u32.totalorder %s137_s27, %s244_s1 }
  0x17   :  { %p143_p10 = pnand %p141_p9, %p138_p8 }
  0x19   :  { %146 = shalt.err (!%p143_p10)
}
  0x1a   :  { %s147_s4 = scalar_lea.vmem %s36_s24, 256  ;;  %p152_p12 = scmp.lt.s32.totalorder %s36_s24, %s36_s24 }
  0x1b   :  { %p148_p11 = scmp.ne.s32.totalorder %s36_s24, %s147_s4  ;;  %p153_p13 = scmp.lt.s32.totalorder %s147_s4, %s147_s4 }
  0x1d   :  { %p154_p0 = por %p153_p13, %p152_p12 }
  0x1f   :  { %p155_p1 = pnand %p154_p0, %p148_p11 }
  0x21   :  { %158 = shalt.err (!%p155_p1)
}
  0x22   :  { %41 = dma.hbm_to_vmem [thread:$0]  %s244_s1, 256, %s36_s24, [#allocation7], %s188_s19, %s188_s19, %s189_s20  }
  0x23   :  { %181 = dma.done.wait [#allocation4], 256  }
  0x24   :  { %182 = vsyncadd [#allocation4], 4294967040 }
  0x25   :  { %183 = dma.done.wait [#allocation7], 256  }
  0x26   :  { %184 = vsyncadd [#allocation7], 4294967040  ;;  %v57_v0 = vld [vmem:[#allocation3] sm:$0xff]  ;;  %v58_v1 = vld [vmem:[#allocation3 + $0x8] sm:$0xff]  ;;  %s191_s1 = smov [#allocation8]  }
  0x27   :  { %v59_v2 = vld [vmem:[#allocation6] sm:$0xff]  ;;  %v60_v3 = vld [vmem:[#allocation6 + $0x8] sm:$0xff]  ;;  %s96_s6 = sshll.u32 %s191_s1, 4  ;;  %s97_s6 = int_to_ptr.vmem [resolvable:$true] %s96_s6 }
  0x28   :  { %v61_v4 = vsub.f32 %v57_v0, %v59_v2  ;;  %v62_v5 = vsub.f32 %v58_v1, %v60_v3  ;;  %s159_s7 = scalar_lea.vmem %s97_s6, 128  ;;  %p164_p3 = scmp.lt.s32.totalorder %s97_s6, %s97_s6 }
  0x29   :  { %p160_p2 = scmp.ne.s32.totalorder %s97_s6, %s159_s7  ;;  %p165_p4 = scmp.lt.s32.totalorder %s159_s7, %s159_s7 }
  0x2a   :  { %v63_v6 = vmul.f32 %v61_v4, %v61_v4  ;;  %v64_v7 = vmul.f32 %v62_v5, %v62_v5 }
  0x2b   :  { %p166_p5 = por %p165_p4, %p164_p3 }
  0x2c   :  { %v65_v8 = vadd.f32 1e-06, %v63_v6  ;;  %v66_v9 = vadd.f32 1e-06, %v64_v7 }
  0x2d   :  { %p167_p6 = pnand %p166_p5, %p160_p2 }
  0x2e   :  { %111 = vrsqrt.f32 %v65_v8  ;;  %vm69_vm0 = vcmp.eq.f32.partialorder %v65_v8, inf  ;;  %v72_v11 = vand.u32 2147483648, %v65_v8  ;;  %vm71_vm1 = vcmp.eq.f32.partialorder %v65_v8, 0.0 }
  0x2f   :  { %113 = vrsqrt.f32 %v66_v9  ;;  %vm76_vm2 = vcmp.eq.f32.partialorder %v66_v9, inf  ;;  %v79_v14 = vand.u32 2147483648, %v66_v9  ;;  %vm78_vm3 = vcmp.eq.f32.partialorder %v66_v9, 0.0 }
  0x38   :  { %v112_v10 = vpop.eup %111 }
  0x39   :  { %v114_v12 = vpop.eup %113  ;;  %v68_v13 = vmul.f32 %v112_v10, %v65_v8 }
  0x3a   :  { %v75_v15 = vmul.f32 %v114_v12, %v66_v9 }
  0x3b   :  { %v70_v16 = vsel %vm69_vm0, %v65_v8, %v68_v13 }
  0x3c   :  { %v73_v17 = vsel %vm71_vm1, %v72_v11, %v70_v16  ;;  %v77_v18 = vsel %vm76_vm2, %v66_v9, %v75_v15 }
  0x3d   :  { %v80_v19 = vsel %vm78_vm3, %v79_v14, %v77_v18 }
  0x3e   :  { %v82_v20 = vadd.f32 %v80_v19, %v73_v17 }
  0x40   :  { %89 = vst [vmem:[#allocation8] sm:$0xff] %v82_v20 }
  0x41   :  { %170 = shalt.err (!%p167_p6)
}
  0x42   :  { %s171_s10 = scalar_lea.hbm %s245_s2, 128 }
  0x43   :  { %p172_p7 = scmp.ne.s32.totalorder %s245_s2, %s171_s10  ;;  %p175_p8 = scmp.lt.u32.totalorder %s171_s10, %s245_s2 }
  0x45   :  { %p177_p9 = pnand %p175_p8, %p172_p7 }
  0x47   :  { %180 = shalt.err (!%p177_p9)
}
  0x48   :  { %99 = dma.vmem_to_hbm [thread:$0]  %s97_s6, 128, %s245_s2, [#allocation5]  }
  0x49   :  { %185 = dma.done.wait [#allocation5], 128  }
  0x4a   :  { %186 = vsyncadd [#allocation5], 4294967168 }
  0x4b   :  { %103 = vsyncpa [#allocation4], 1 }
  0x4c   :  { %104 = vsyncpa [#allocation7], 1 }
  0x4d   :  { %105 = vsyncpa [#allocation5], 1 }

</bundles_post_ra>
